<compile_context>
chip_gen: v6e
topology: v6e:2x2x1
jax: 0.10.0
libtpu: 0.0.40
codegen_flags: <defaults>
</compile_context>

<pallas_src>
import math
import functools

import jax
import jax.numpy as jnp
from jax.experimental import pallas as pl
from jax.experimental.pallas import tpu as pltpu


def _sin_time_emb_kernel(freqs_ref, t_ref, out_ref, *, half_dim: int):
    """out[k, b] = sin(t_b * f_k) for k < half_dim, else cos(t_b * f_{k-half_dim})."""
    t = t_ref[...]        # (1, TB)   timesteps on the lane axis
    f = freqs_ref[...]    # (dim, 1)  duplicated frequency column (resident constant)
    emb = f * t           # (dim, TB) VPU broadcast multiply
    if half_dim % 8 == 0:
        # sublane-tile aligned slices: no relayout, each half is one slab store
        out_ref[:half_dim, :] = jnp.sin(emb[:half_dim, :])
        out_ref[half_dim:, :] = jnp.cos(emb[half_dim:, :])
    else:
        row = jax.lax.broadcasted_iota(jnp.int32, emb.shape, 0)
        out_ref[...] = jnp.where(row < half_dim, jnp.sin(emb), jnp.cos(emb))


def sinusoidal_time_embedding(t, dim: int, *, tb: int = 512):
    """JAX wrapper mirroring SinusoidalTimeEmbedding.forward semantics."""
    t = jnp.asarray(t, dtype=jnp.float32)
    if t.ndim == 0:
        t = t[None]
    assert t.ndim == 1, "t must be scalar or 1-D, like the PyTorch module"
    assert dim % 2 == 0 and dim >= 4, "dim must be even and >= 4 (half_dim - 1 > 0)"
    B = int(t.shape[0])
    half_dim = dim // 2

    # Hoisted compile-time frequency table, duplicated -> [sin | cos] is a sublane slice.
    emb_factor = math.log(10000.0) / (half_dim - 1)
    f_half = jnp.exp(jnp.arange(half_dim, dtype=jnp.float32) * -emb_factor)
    freqs = jnp.concatenate([f_half, f_half]).reshape(dim, 1)

    # Tile the batch (lane axis) in 512-lane blocks; pad up when B > one block.
    if B <= tb:
        tb_eff, b_padded = B, B
    else:
        tb_eff = tb
        b_padded = pl.cdiv(B, tb) * tb
    t_pad = t if b_padded == B else jnp.pad(t, (0, b_padded - B))
    t_row = t_pad.reshape(1, b_padded)
    grid = (b_padded // tb_eff,)

    out_t = pl.pallas_call(
        functools.partial(_sin_time_emb_kernel, half_dim=half_dim),
        out_shape=jax.ShapeDtypeStruct((dim, b_padded), jnp.float32),
        grid=grid,
        in_specs=[
            pl.BlockSpec((dim, 1), lambda i: (0, 0)),        # freqs: resident constant
            pl.BlockSpec((1, tb_eff), lambda i: (0, i)),     # t: 512 lanes per block
        ],
        out_specs=pl.BlockSpec((dim, tb_eff), lambda i: (0, i)),
        compiler_params=pltpu.CompilerParams(
            dimension_semantics=("parallel",),               # v7x: shard batch over 2 TCs
        ),
    )(freqs, t_row)

    emb = out_t.T                                            # back to (B_padded, dim)
    return emb[:B] if b_padded != B else emb


def _reference(t, dim: int):
    """Pure-JAX reference mirroring the PyTorch module."""
    t = jnp.asarray(t, dtype=jnp.float32)
    if t.ndim == 0:
        t = t[None]
    half_dim = dim // 2
    emb_factor = math.log(10000.0) / (half_dim - 1)
    emb = jnp.exp(jnp.arange(half_dim, dtype=jnp.float32) * -emb_factor)
    emb = t[:, None] * emb[None, :]
    return jnp.concatenate([jnp.sin(emb), jnp.cos(emb)], axis=-1)


if __name__ == "__main__":
    # SinusoidalTimeEmbedding has no learned parameters; dim is the only config.
    DIM = 32      # embedding dim (half_dim = 16)
    BATCH = 8     # batch of timesteps

    key = jax.random.PRNGKey(0)
    t_small = jax.random.uniform(key, (BATCH,), dtype=jnp.float32) * 1000.0

    emb = jax.block_until_ready(sinusoidal_time_embedding(t_small, DIM))
    ref = _reference(t_small, DIM)
    assert emb.shape == (BATCH, DIM), emb.shape
    assert jnp.allclose(emb, ref, atol=1e-4, rtol=1e-4), "mismatch vs reference (small B)"

    # Also exercise the gridded / padded path (B not a multiple of the 512-lane tile).
    t_big = jax.random.uniform(jax.random.PRNGKey(0), (600,), dtype=jnp.float32) * 1000.0
    emb_big = jax.block_until_ready(sinusoidal_time_embedding(t_big, DIM))
    ref_big = _reference(t_big, DIM)
    assert emb_big.shape == (600, DIM), emb_big.shape
    assert jnp.allclose(emb_big, ref_big, atol=1e-4, rtol=1e-4), "mismatch vs reference (grid)"

    print("KERNEL_OK")
</pallas_src>

<mosaic_0001>
module attributes {stable_mosaic.version = 11 : i64} {
  func.func @_sin_time_emb_kernel(%arg0: i32, %arg1: memref<32x1xf32, #tpu.memory_space<vmem>>, %arg2: memref<1x8xf32, #tpu.memory_space<vmem>>, %arg3: memref<32x8xf32, #tpu.memory_space<vmem>>) attributes {dimension_semantics = [#tpu.dimension_semantics<parallel>], iteration_bounds = array<i64: 1>, scalar_prefetch = 0 : i64, scratch_operands = 0 : i64, tpu.core_type = #tpu.core_type<tc>, window_params = [{pipeline_mode = #tpu.pipeline_mode<synchronous>, transform_indices = @transform_0, window_bounds = array<i64: 32, 1>}, {transform_indices = @transform_1, window_bounds = array<i64: 1, 8>}, {transform_indices = @transform_2, window_bounds = array<i64: 32, 8>}]} {
    %c0 = arith.constant 0 : index
    %c0_0 = arith.constant 0 : index
    %0 = vector.load %arg2[%c0, %c0_0] : memref<1x8xf32, #tpu.memory_space<vmem>>, vector<1x8xf32>
    %c0_1 = arith.constant 0 : index
    %c0_2 = arith.constant 0 : index
    %1 = vector.load %arg1[%c0_1, %c0_2] : memref<32x1xf32, #tpu.memory_space<vmem>>, vector<32x1xf32>
    %2 = vector.broadcast %1 : vector<32x1xf32> to vector<32x8xf32>
    %3 = vector.broadcast %0 : vector<1x8xf32> to vector<32x8xf32>
    %4 = arith.mulf %2, %3 : vector<32x8xf32>
    %5 = vector.extract_strided_slice %4 {offsets = [0, 0], sizes = [16, 8], strides = [1, 1]} : vector<32x8xf32> to vector<16x8xf32>
    %6 = math.sin %5 : vector<16x8xf32>
    %c0_3 = arith.constant 0 : index
    %c0_4 = arith.constant 0 : index
    %7 = vector.load %arg3[%c0_3, %c0_4] : memref<32x8xf32, #tpu.memory_space<vmem>>, vector<16x8xf32>
    tpu.vector_store %arg3[%c0_3, %c0_4], %6 {strides = array<i32>} : memref<32x8xf32, #tpu.memory_space<vmem>>, vector<16x8xf32>,
    %8 = vector.extract_strided_slice %4 {offsets = [16, 0], sizes = [16, 8], strides = [1, 1]} : vector<32x8xf32> to vector<16x8xf32>
    %9 = math.cos %8 : vector<16x8xf32>
    %c16 = arith.constant 16 : index
    %c0_5 = arith.constant 0 : index
    %10 = vector.load %arg3[%c16, %c0_5] : memref<32x8xf32, #tpu.memory_space<vmem>>, vector<16x8xf32>
    tpu.vector_store %arg3[%c16, %c0_5], %9 {strides = array<i32>} : memref<32x8xf32, #tpu.memory_space<vmem>>, vector<16x8xf32>,
    return
  }
  func.func @transform_0(%arg0: i32) -> (i32, i32) {
    %c0_i32 = arith.constant 0 : i32
    %c0_i32_0 = arith.constant 0 : i32
    %c0_i32_1 = arith.constant 0 : i32
    return %c0_i32, %c0_i32_0 : i32, i32
  }
  func.func @transform_1(%arg0: i32) -> (i32, i32) {
    %c0_i32 = arith.constant 0 : i32
    %c0_i32_0 = arith.constant 0 : i32
    return %c0_i32, %arg0 : i32, i32
  }
  func.func @transform_2(%arg0: i32) -> (i32, i32) {
    %c0_i32 = arith.constant 0 : i32
    %c0_i32_0 = arith.constant 0 : i32
    return %c0_i32, %arg0 : i32, i32
  }
}

</mosaic_0001>

<bundles_post_ra>
// kernel: tpu_custom_call.1
= control target key start
LH: loop header
LB: loop body
LE: loop exit
PB: predicated region body
PF: predicated region fallthrough
CT: control target
= control target key end

     0   :  { %v527_v0 = vmov 0   ;;  %v528_v39 = vmov 683565275   ;;  %v529_v43 = vmov 2475754826   ;;  %s847_s0 = inlined_call_operand.vmem [shape: f32[32,1], index: 0, kind: input, shape index: {}]   ;;  %s848_s1 = inlined_call_operand.vmem [shape: f32[1,8], index: 1, kind: input, shape index: {}]   ;;  %s849_s2 = inlined_call_operand.vmem [shape: f32[32,8], index: 2, kind: output, shape index: {}]  }
   0x1   :  { %510 = vset.pattern.permute.xlu1 %v527_v0  ;;  %509 = vset.pattern.permute.xlu0 %v527_v0  ;;  %v14_v1 = vld [vmem:[%s847_s0 + $0x10] sm:$0xff]  ;;  %v12_v2 = vld [vmem:[%s847_s0] sm:$0xff]  ;;  %v15_v3 = vld [vmem:[%s847_s0 + $0x18] sm:$0xff]  ;;  %v530_v45 = vmov 2131351028  }
   0x2   :  { %28 = vperm.xlu1 %510, %v14_v1   ;;  %18 = vperm.xlu0 %509, %v12_v2   ;;  %v13_v4 = vld [vmem:[%s847_s0 + $0x8] sm:$0xff]  ;;  %v469_v5 = vld [vmem:[%s848_s1] ss:$0 sm:$0xff]  ;;  %v531_v47 = vmov 2102212464  }
   0x3   :  { %v532_v49 = vmov 920167782   ;;  %v533_v56 = vmov 1326507024  }
   0x6   :  { %33 = vperm.xlu1 %510, %v15_v3   ;;  %23 = vperm.xlu0 %509, %v13_v4  }
  0x7d   :  { %v29_v6 = vpop.permute.xlu1 %28  ;;  %v19_v7 = vpop.permute.xlu0 %18 }
  0x7e   :  { %v564_v8 = vmul.f32 %v469_v5, %v29_v6  ;;  %v566_v9 = vmul.f32 %v469_v5, %v19_v7 }
  0x80   :  { %v257_v10 = vand.u32 2147483647, %v564_v8  ;;  %v260_v11 = vand.u32 2139095040, %v564_v8  ;;  %v46_v12 = vand.u32 2147483647, %v566_v9  ;;  %v49_v13 = vand.u32 2139095040, %v566_v9 }
  0x81   :  { %v34_v14 = vpop.permute.xlu1 %33  ;;  %v24_v28 = vpop.permute.xlu0 %23  ;;  %vm259_vm15 = vcmp.lt.s32.totalorder %v564_v8, 0 }
  0x82   :  { %v261_v15 = vshrl.u32 %v260_v11, 23  ;;  %v572_v16 = vmul.f32 %v469_v5, %v34_v14  ;;  %v264_v17 = vand.u32 8388607, %v257_v10  ;;  %v50_v18 = vshrl.u32 %v49_v13, 23 }
  0x83   :  { %v53_v19 = vand.u32 8388607, %v46_v12  ;;  %v585_v37 = vmul.f32 %v469_v5, %v24_v28 }
  0x84   :  { %v478_v20 = vadd.s32 4294967169, %v261_v15  ;;  %v470_v21 = vadd.s32 4294967169, %v50_v18  ;;  %v363_v22 = vand.u32 2139095040, %v572_v16  ;;  %v265_v24 = vor.u32 8388608, %v264_v17 }
  0x85   :  { %v54_v25 = vor.u32 8388608, %v53_v19 }
  0x86   :  { %v267_v23 = vadd.s32 1, %v478_v20  ;;  %v56_v26 = vadd.s32 1, %v470_v21  ;;  %v364_v27 = vshrl.u32 %v363_v22, 23  ;;  %v579_v34 = vshll.u32 %v265_v24, 8 }
  0x87   :  { %v583_v36 = vshll.u32 %v54_v25, 8 }
  0x88   :  { %vm268_vm0 = vcmp.gt.s32.totalorder %v267_v23, 0  ;;  %vm57_vm1 = vcmp.gt.s32.totalorder %v56_v26, 0  ;;  %v482_v30 = vadd.s32 4294967169, %v364_v27 }
  0x89   :  { %v269_v29 = vsel %vm268_vm0, %v267_v23, 0  ;;  %v58_v33 = vsel %vm57_vm1, %v56_v26, 0 }
  0x8a   :  { %v270_v31 = vshrl.u32 %v269_v29, 5  ;;  %v271_v32 = vand.u32 31, %v269_v29  ;;  %v581_v35 = vshrl.u32 %v58_v33, 5  ;;  %v60_v41 = vand.u32 31, %v58_v33 }
  0x8b   :  { %v588_v42 = vadd.s32 1, %v482_v30 }
  0x8c   :  { %v272_v38 = vsub.s32 32, %v271_v32  ;;  %v274_v40 = vshll.u32 %v528_v39, %v271_v32  ;;  %v277_v44 = vshll.u32 %v529_v43, %v271_v32  ;;  %v280_v46 = vshll.u32 %v530_v45, %v271_v32 }
  0x8d   :  { %v283_v48 = vshll.u32 %v531_v47, %v271_v32  ;;  %v286_v50 = vshll.u32 %v532_v49, %v271_v32  ;;  %vm289_vm2 = vcmp.lt.s32.totalorder %v270_v31, 1  ;;  %vm290_vm3 = vcmp.lt.s32.totalorder %v270_v31, 2 }
  0x8e   :  { %v275_v51 = vshrl.u32 %v529_v43, %v272_v38  ;;  %v278_v52 = vshrl.u32 %v530_v45, %v272_v38  ;;  %v281_v53 = vshrl.u32 %v531_v47, %v272_v38  ;;  %v273_v54 = vshrl.u32 %v528_v39, %v272_v38 }
  0x8f   :  { %v284_v55 = vshrl.u32 %v532_v49, %v272_v38  ;;  %v287_v57 = vshrl.u32 %v533_v56, %v272_v38  ;;  %v61_v61 = vsub.s32 32, %v60_v41  ;;  %vm291_vm4 = vcmp.lt.s32.totalorder %v270_v31, 3 }
  0x90   :  { %v276_v58 = vor.u32 %v275_v51, %v274_v40  ;;  %v279_v59 = vor.u32 %v278_v52, %v277_v44  ;;  %v282_v60 = vor.u32 %v281_v53, %v280_v46  ;;  %vm292_vm5 = vcmp.lt.s32.totalorder %v270_v31, 4 }
  0x91   :  { %v285_v62 = vor.u32 %v284_v55, %v283_v48  ;;  %v288_v63 = vor.u32 %v287_v57, %v286_v50  ;;  %v63_v7 = vshll.u32 %v528_v39, %v60_v41  ;;  %v64_v14 = vshrl.u32 %v529_v43, %v61_v61 }
  0x92   :  { %v293_v0 = vsel %vm289_vm2, %v273_v54, %v276_v58  ;;  %v294_v1 = vsel %vm292_vm5, %v282_v60, 2102212464  ;;  %v297_v2 = vsel %vm289_vm2, %v276_v58, %v279_v59  ;;  %v301_v3 = vsel %vm289_vm2, %v279_v59, %v282_v60 }
  0x93   :  { %v295_v4 = vsel %vm291_vm4, %v279_v59, %v294_v1  ;;  %v298_v5 = vsel %vm292_vm5, %v285_v62, 920167782  ;;  %v302_v6 = vsel %vm292_vm5, %v288_v63, 1326507024  ;;  %v66_v15 = vshll.u32 %v529_v43, %v60_v41 }
  0x94   :  { %v299_v11 = vsel %vm291_vm4, %v282_v60, %v298_v5  ;;  %v303_v13 = vsel %vm291_vm4, %v285_v62, %v302_v6  ;;  %v296_v17 = vsel %vm290_vm3, %v293_v0, %v295_v4  ;;  %v67_v20 = vshrl.u32 %v530_v45, %v61_v61 }
  0x95   :  { %v300_v18 = vsel %vm290_vm3, %v297_v2, %v299_v11  ;;  %v304_v19 = vsel %vm290_vm3, %v301_v3, %v303_v13  ;;  %v65_v25 = vor.u32 %v64_v14, %v63_v7  ;;  %v69_v27 = vshll.u32 %v530_v45, %v60_v41 }
  0x96   :  { %v611_v21 = vmul.u32.u64.low %v579_v34, %v304_v19  ;;  %v612_v22 = vmul.u32.u64.high %v579_v34, %v304_v19, %v611_v21  ;;  %v615_v23 = vmul.u32.u64.low %v579_v34, %v300_v18  ;;  %v616_v24 = vmul.u32.u64.high %v579_v34, %v300_v18, %v615_v23 }
  0x97   :  { %v68_v26 = vor.u32 %v67_v20, %v66_v15  ;;  %v70_v28 = vshrl.u32 %v531_v47, %v61_v61  ;;  %v62_v29 = vshrl.u32 %v528_v39, %v61_v61  ;;  %v72_v30 = vshll.u32 %v531_v47, %v60_v41 }
  0x98   :  { %v73_v31 = vshrl.u32 %v532_v49, %v61_v61  ;;  %v76_v32 = vshrl.u32 %v533_v56, %v61_v61  ;;  %v312_v33 = vmul.u32 %v579_v34, %v296_v17  ;;  %v75_v40 = vshll.u32 %v532_v49, %v60_v41 }
  0x99   :  { %v71_v38 = vor.u32 %v70_v28, %v69_v27  ;;  %vm78_vm6 = vcmp.lt.s32.totalorder %v581_v35, 1  ;;  %vm314_vm7 = vc.u32 %v612_v22, %v615_v23  ;;  %v315_v44 = vadd.s32 1, %v616_v24 }
  0x9a   :  { %v74_v46 = vor.u32 %v73_v31, %v72_v30  ;;  %vm79_vm8 = vcmp.lt.s32.totalorder %v581_v35, 2  ;;  %v77_v48 = vor.u32 %v76_v32, %v75_v40  ;;  %vm80_vm9 = vcmp.lt.s32.totalorder %v581_v35, 3 }
  0x9b   :  { %vm81_vm10 = vcmp.lt.s32.totalorder %v581_v35, 4  ;;  %v86_v50 = vsel %vm78_vm6, %v65_v25, %v68_v26  ;;  %v316_v34 = vsel %vm314_vm7, %v315_v44, %v616_v24  ;;  %v90_v52 = vsel %vm78_vm6, %v68_v26, %v71_v38 }
  0x9c   :  { %v83_v51 = vsel %vm81_vm10, %v71_v38, 2102212464  ;;  %v87_v41 = vsel %vm81_vm10, %v74_v46, 920167782  ;;  %v317_v53 = vadd.s32 %v316_v34, %v312_v33  ;;  %v82_v54 = vsel %vm78_vm6, %v62_v29, %v65_v25 }
  0x9d   :  { %v88_v55 = vsel %vm80_vm9, %v71_v38, %v87_v41  ;;  %v91_v57 = vsel %vm81_vm10, %v77_v48, 1326507024  ;;  %v84_v58 = vsel %vm80_vm9, %v68_v26, %v83_v51  ;;  %vm371_vm11 = vcmp.gt.s32.totalorder %v588_v42, 0 }
  0x9e   :  { %v89_v59 = vsel %vm79_vm8, %v86_v50, %v88_v55  ;;  %v92_v60 = vsel %vm80_vm9, %v74_v46, %v91_v57  ;;  %v318_v61 = vadd.s32 536870912, %v317_v53  ;;  %v360_v3 = vand.u32 2147483647, %v572_v16 }
  0x9f   :  { %v93_v62 = vsel %vm79_vm8, %v90_v52, %v92_v60  ;;  %v641_v63 = vmul.u32.u64.low %v583_v36, %v89_v59  ;;  %v642_v0 = vmul.u32.u64.high %v583_v36, %v89_v59, %v641_v63  ;;  %v372_v4 = vsel %vm371_vm11, %v588_v42, 0 }
  0xa0   :  { %v646_v1 = vmul.u32.u64.low %v583_v36, %v93_v62  ;;  %v647_v2 = vmul.u32.u64.high %v583_v36, %v93_v62, %v646_v1  ;;  %v651_v5 = vshrl.u32 %v318_v61, 30  ;;  %v85_v6 = vsel %vm79_vm8, %v82_v54, %v84_v58 }
  0xa1   :  { %v374_v7 = vand.u32 31, %v372_v4  ;;  %v104_v13 = vadd.s32 1, %v642_v0  ;;  %v101_v15 = vmul.u32 %v583_v36, %v85_v6  ;;  %v367_v17 = vand.u32 8388607, %v360_v3 }
  0xa2   :  { %v320_v11 = vshll.u32 %v651_v5, 30  ;;  %vm103_vm12 = vc.u32 %v647_v2, %v641_v63  ;;  %v153_v42 = vand.u32 2139095040, %v585_v37  ;;  %v373_v36 = vshrl.u32 %v372_v4, 5 }
  0xa3   :  { %v375_v14 = vsub.s32 32, %v374_v7  ;;  %v105_v35 = vsel %vm103_vm12, %v104_v13, %v642_v0  ;;  %v368_v26 = vor.u32 8388608, %v367_v17  ;;  %v377_v29 = vshll.u32 %v528_v39, %v374_v7 }
  0xa4   :  { %v321_v18 = vsub.s32 %v317_v53, %v320_v11  ;;  %v106_v19 = vadd.s32 %v105_v35, %v101_v15  ;;  %v154_v27 = vshrl.u32 %v153_v42, 23  ;;  %v380_v30 = vshll.u32 %v529_v43, %v374_v7 }
  0xa5   :  { %v378_v21 = vshrl.u32 %v529_v43, %v375_v14  ;;  %v381_v24 = vshrl.u32 %v530_v45, %v375_v14  ;;  %v384_v31 = vshrl.u32 %v531_v47, %v375_v14  ;;  %v383_v33 = vshll.u32 %v530_v45, %v374_v7 }
  0xa6   :  { %v323_v20 = vsub.s32 0, %v321_v18  ;;  %v107_v25 = vadd.s32 536870912, %v106_v19  ;;  %v386_v38 = vshll.u32 %v531_v47, %v374_v7  ;;  %v387_v40 = vshrl.u32 %v532_v49, %v375_v14 }
  0xa7   :  { %v379_v46 = vor.u32 %v378_v21, %v377_v29  ;;  %v382_v48 = vor.u32 %v381_v24, %v380_v30  ;;  %v390_v50 = vshrl.u32 %v533_v56, %v375_v14  ;;  %v676_v41 = vshll.u32 %v368_v26, 8 }
  0xa8   :  { %v479_v28 = vmin.u32 %v323_v20, %v321_v18  ;;  %v669_v32 = vshrl.u32 %v107_v25, 30  ;;  %v388_v51 = vor.u32 %v387_v40, %v386_v38  ;;  %v313_v52 = vadd.s32 %v615_v23, %v612_v22 }
  0xa9   :  { %v385_v54 = vor.u32 %v384_v31, %v383_v33  ;;  %v389_v55 = vshll.u32 %v532_v49, %v374_v7  ;;  %vm392_vm13 = vcmp.lt.s32.totalorder %v373_v36, 1  ;;  %vm395_vm14 = vcmp.lt.s32.totalorder %v373_v36, 4 }
  0xaa   :  { %v325_v44 = vclz %v479_v28  ;;  %v109_v34 = vshll.u32 %v669_v32, 30  ;;  %v474_v58 = vadd.s32 4294967169, %v154_v27  ;;  %v400_v60 = vsel %vm392_vm13, %v379_v46, %v382_v48 }
  0xab   :  { %v391_v59 = vor.u32 %v390_v50, %v389_v55  ;;  %v401_v61 = vsel %vm395_vm14, %v388_v51, 920167782  ;;  %vm393_vm1 = vcmp.lt.s32.totalorder %v373_v36, 2  ;;  %vm394_vm2 = vcmp.lt.s32.totalorder %v373_v36, 3 }
  0xac   :  { %v480_v53 = vadd.s32 4294967294, %v325_v44  ;;  %v681_v57 = vsub.s32 %v106_v19, %v109_v34  ;;  %v397_v1 = vsel %vm395_vm14, %v385_v54, 2102212464  ;;  %v402_v4 = vsel %vm394_vm2, %v385_v54, %v401_v61 }
  0xad   :  { %v376_v11 = vshrl.u32 %v528_v39, %v375_v14  ;;  %v403_v13 = vsel %vm393_vm1, %v400_v60, %v402_v4  ;;  %v404_v42 = vsel %vm392_vm13, %v382_v48, %v385_v54  ;;  %v405_v35 = vsel %vm395_vm14, %v391_v59, 1326507024 }
  0xae   :  { %vm481_vm0 = vcmp.lt.s32.totalorder %v480_v53, 0  ;;  %v112_v22 = vsub.s32 0, %v681_v57  ;;  %v343_v19 = vsub.s32 4, %v651_v5  ;;  %v398_v24 = vsel %vm394_vm2, %v382_v48, %v397_v1 }
  0xaf   :  { %v328_v62 = vsel %vm481_vm0, 0, %v480_v53  ;;  %v396_v21 = vsel %vm392_vm13, %v376_v11, %v379_v46  ;;  %v406_v26 = vsel %vm394_vm2, %v388_v51, %v405_v35  ;;  %v150_v14 = vand.u32 2147483647, %v585_v37 }
  0xb0   :  { %v329_v23 = vsub.s32 32, %v328_v62  ;;  %v333_v0 = vsub.s32 4294967266, %v328_v62  ;;  %v330_v6 = vshll.u32 %v321_v18, %v328_v62  ;;  %v471_v7 = vmin.u32 %v112_v22, %v681_v57 }
  0xb1   :  { %v407_v28 = vsel %vm393_vm1, %v404_v42, %v406_v26  ;;  %v701_v29 = vmul.u32.u64.low %v676_v41, %v403_v13  ;;  %v702_v30 = vmul.u32.u64.high %v676_v41, %v403_v13, %v701_v29  ;;  %v399_v33 = vsel %vm393_vm1, %v396_v21, %v398_v24 }
  0xb2   :  { %v331_v15 = vshrl.u32 %v313_v52, %v329_v23  ;;  %v334_v17 = vadd.s32 127, %v333_v0  ;;  %v114_v20 = vclz %v471_v7  ;;  %v344_v44 = vsel %vm259_vm15, %v343_v19, %v651_v5 }
  0xb3   :  { %v707_v38 = vmul.u32.u64.low %v676_v41, %v407_v28  ;;  %v708_v40 = vmul.u32.u64.high %v676_v41, %v407_v28, %v707_v38  ;;  %v102_v46 = vadd.s32 %v641_v63, %v647_v2  ;;  %v160_v48 = vadd.s32 1, %v474_v58 }
  0xb4   :  { %v332_v18 = vor.u32 %v331_v15, %v330_v6  ;;  %v335_v25 = vshll.u32 %v334_v17, 23  ;;  %v472_v27 = vadd.s32 4294967294, %v114_v20  ;;  %v132_v52 = vsub.s32 4, %v669_v32 }
  0xb5   :  { %v415_v54 = vmul.u32 %v676_v41, %v399_v33  ;;  %v418_v55 = vadd.s32 1, %v702_v30  ;;  %vm417_vm4 = vc.u32 %v708_v40, %v701_v29  ;;  %vm161_vm5 = vcmp.gt.s32.totalorder %v160_v48, 0 }
  0xb6   :  { %v336_v31 = vor.u32 4788187, %v335_v25  ;;  %vm473_vm3 = vcmp.lt.s32.totalorder %v472_v27, 0  ;;  %v339_v34 = vcvt.s32.f32 %v332_v18  ;;  %v162_v58 = vsel %vm161_vm5, %v160_v48, 0 }
  0xb7   :  { %v117_v51 = vsel %vm473_vm3, 0, %v472_v27  ;;  %v419_v5 = vsel %vm417_vm4, %v418_v55, %v702_v30  ;;  %vm724_vm6 = vcmp.le.f32.partialorder %v257_v10, 0.7853982  ;;  %v164_v22 = vand.u32 31, %v162_v58 }
  0xb8   :  { %v337_v50 = vand.u32 2147483647, %v336_v31  ;;  %v118_v36 = vsub.s32 32, %v117_v51  ;;  %v122_v53 = vsub.s32 4294967266, %v117_v51  ;;  %v119_v60 = vshll.u32 %v681_v57, %v117_v51 }
  0xb9   :  { %v420_v62 = vadd.s32 %v419_v5, %v415_v54  ;;  %v346_v57 = vsel %vm724_vm6, 0, %v344_v44  ;;  %vm48_vm7 = vcmp.lt.s32.totalorder %v566_v9, 0  ;;  %v165_v6 = vsub.s32 32, %v164_v22 }
  0xba   :  { %v340_v59 = vmul.f32 %v339_v34, %v337_v50  ;;  %v120_v63 = vshrl.u32 %v102_v46, %v118_v36  ;;  %v123_v2 = vadd.s32 127, %v122_v53  ;;  %v133_v10 = vsel %vm48_vm7, %v132_v52, %v669_v32 }
  0xbb   :  { %v421_v4 = vadd.s32 536870912, %v420_v62  ;;  %v157_v13 = vand.u32 8388607, %v150_v14  ;;  %v741_v15 = vand.u32 3, %v346_v57  ;;  %vm745_vm8 = vcmp.le.f32.partialorder %v46_v12, 0.7853982 }
  0xbc   :  { %v341_v41 = vxor.u32 2147483648, %v340_v59  ;;  %v121_v23 = vor.u32 %v120_v63, %v119_v60  ;;  %v124_v0 = vshll.u32 %v123_v2, 23  ;;  %v135_v19 = vsel %vm745_vm8, 0, %v133_v10 }
  0xbd   :  { %v749_v32 = vshrl.u32 %v421_v4, 30  ;;  %v168_v21 = vshrl.u32 %v529_v43, %v165_v6  ;;  %v171_v24 = vshrl.u32 %v530_v45, %v165_v6  ;;  %v174_v18 = vshrl.u32 %v531_v47, %v165_v6 }
  0xbe   :  { %v342_v1 = vsel %vm259_vm15, %v341_v41, %v340_v59  ;;  %v125_v11 = vor.u32 4788187, %v124_v0  ;;  %v128_v35 = vcvt.s32.f32 %v121_v23  ;;  %v158_v25 = vor.u32 8388608, %v157_v13 }
  0xbf   :  { %v345_v7 = vsel %vm724_vm6, %v564_v8, %v342_v1  ;;  %v423_v20 = vshll.u32 %v749_v32, 30  ;;  %v757_v26 = vshrl.u32 %v162_v58, 5  ;;  %v177_v27 = vshrl.u32 %v532_v49, %v165_v6 }
  0xc0   :  { %511 = vcosq.f32 %v345_v7  ;;  %v126_v42 = vand.u32 2147483647, %v125_v11  ;;  %v167_v30 = vshll.u32 %v528_v39, %v164_v22  ;;  %v170_v31 = vshll.u32 %v529_v43, %v164_v22 }
  0xc1   :  { %513 = vsinq.f32 %v345_v7  ;;  %v760_v28 = vsub.s32 %v420_v62, %v423_v20  ;;  %v173_v33 = vshll.u32 %v530_v45, %v164_v22  ;;  %v176_v44 = vshll.u32 %v531_v47, %v164_v22 }
  0xc2   :  { %v129_v12 = vmul.f32 %v128_v35, %v126_v42  ;;  %v179_v46 = vshll.u32 %v532_v49, %v164_v22  ;;  %v180_v48 = vshrl.u32 %v533_v56, %v165_v6  ;;  %v169_v34 = vor.u32 %v168_v21, %v167_v30 }
  0xc3   :  { %v426_v50 = vsub.s32 0, %v760_v28  ;;  %v172_v51 = vor.u32 %v171_v24, %v170_v31  ;;  %v175_v52 = vor.u32 %v174_v18, %v173_v33  ;;  %vm355_vm9 = vcmp.eq.s32.totalorder %v741_v15, 2 }
  0xc4   :  { %v130_v38 = vxor.u32 2147483648, %v129_v12  ;;  %v178_v43 = vor.u32 %v177_v27, %v176_v44  ;;  %v181_v53 = vor.u32 %v180_v48, %v179_v46  ;;  %vm352_vm10 = vcmp.eq.s32.totalorder %v741_v15, 0 }
  0xc5   :  { %v139_v47 = vadd.s32 3, %v135_v19  ;;  %v483_v49 = vmin.u32 %v426_v50, %v760_v28  ;;  %v198_v56 = vshll.u32 %v158_v25, 8  ;;  %vm254_vm11 = vcmask 64512  }
  0xc6   :  { %v131_v36 = vsel %vm48_vm7, %v130_v38, %v129_v12  ;;  %v166_v54 = vshrl.u32 %v528_v39, %v165_v6  ;;  %vm182_vm12 = vcmp.lt.s32.totalorder %v757_v26, 1  ;;  %vm185_vm13 = vcmp.lt.s32.totalorder %v757_v26, 4 }
  0xc7   :  { %v134_v45 = vsel %vm745_vm8, %v566_v9, %v131_v36  ;;  %v428_v55 = vclz %v483_v49  ;;  %v187_v59 = vsel %vm185_vm13, %v175_v52, 2102212464  ;;  %v190_v60 = vsel %vm182_vm12, %v169_v34, %v172_v51 }
  0xc8   :  { %515 = vcosq.f32 %v134_v45  ;;  %vm184_vm14 = vcmp.lt.s32.totalorder %v757_v26, 3  ;;  %v191_v63 = vsel %vm185_vm13, %v178_v43, 920167782  ;;  %v194_v2 = vsel %vm182_vm12, %v172_v51, %v175_v52 }
  0xc9   :  { %517 = vsinq.f32 %v134_v45  ;;  %v195_v5 = vsel %vm185_vm13, %v181_v53, 1326507024  ;;  %v484_v58 = vadd.s32 4294967294, %v428_v55  ;;  %vm183_vm15 = vcmp.lt.s32.totalorder %v757_v26, 2 }
  0xca   :  { %v192_v61 = vsel %vm184_vm14, %v175_v52, %v191_v63  ;;  %v196_v41 = vsel %vm184_vm14, %v178_v43, %v195_v5  ;;  %v186_v39 = vsel %vm182_vm12, %v166_v54, %v169_v34  ;;  %v188_v22 = vsel %vm184_vm14, %v172_v51, %v187_v59 }
  0xcb   :  { %v193_v57 = vsel %vm183_vm15, %v190_v60, %v192_v61  ;;  %v197_v23 = vsel %vm183_vm15, %v194_v2, %v196_v41  ;;  %vm485_vm0 = vcmp.lt.s32.totalorder %v484_v58, 0  ;;  %v416_v42 = vadd.s32 %v701_v29, %v708_v40 }
  0xcc   :  { %v786_v10 = vmul.u32.u64.low %v198_v56, %v197_v23  ;;  %v787_v4 = vmul.u32.u64.high %v198_v56, %v197_v23, %v786_v10  ;;  %v431_v7 = vsel %vm485_vm0, 0, %v484_v58  ;;  %vm349_vm1 = vweird.f32 %v564_v8 }
  0xcd   :  { %v512_v62 = vpop.eup %511  ;;  %v789_v11 = vmul.u32.u64.low %v198_v56, %v193_v57  ;;  %v790_v13 = vmul.u32.u64.high %v198_v56, %v193_v57, %v789_v11  ;;  %v432_v35 = vsub.s32 32, %v431_v7  ;;  %v436_v19 = vsub.s32 4294967266, %v431_v7 }
  0xce   :  { %v514_v0 = vpop.eup %513  ;;  %v356_v1 = vxor.u32 2147483648, %v512_v62  ;;  %vm351_vm2 = vcmp.lt.s32.totalorder %v741_v15, 2  ;;  %v189_v21 = vsel %vm183_vm15, %v186_v39, %v188_v22  ;;  %v433_v18 = vshll.u32 %v760_v28, %v431_v7 }
  0xcf   :  { %v353_v6 = vxor.u32 2147483648, %v514_v0  ;;  %v434_v12 = vshrl.u32 %v416_v42, %v432_v35  ;;  %v437_v25 = vadd.s32 127, %v436_v19  ;;  %v140_v30 = vand.u32 3, %v139_v47 }
  0xd0   :  { %v357_v17 = vsel %vm355_vm9, %v356_v1, %v514_v0  ;;  %vm207_vm3 = vc.u32 %v787_v4, %v789_v11  ;;  %v208_v8 = vadd.s32 1, %v790_v13  ;;  %v205_v15 = vmul.u32 %v198_v56, %v189_v21 }
  0xd1   :  { %v354_v20 = vsel %vm352_vm10, %v512_v62, %v353_v6  ;;  %v435_v29 = vor.u32 %v434_v12, %v433_v18  ;;  %v438_v40 = vshll.u32 %v437_v25, 23  ;;  %vm145_vm4 = vcmp.eq.s32.totalorder %v140_v30, 2 }
  0xd2   :  { %v358_v24 = vsel %vm351_vm2, %v354_v20, %v357_v17  ;;  %v209_v26 = vsel %vm207_vm3, %v208_v8, %v790_v13  ;;  %vm142_vm5 = vcmp.eq.s32.totalorder %v140_v30, 0  ;;  %vm141_vm6 = vcmp.lt.s32.totalorder %v140_v30, 2 }
  0xd3   :  { %v359_v27 = vsel %vm349_vm1, nan, %v358_v24  ;;  %v439_v31 = vor.u32 4788187, %v438_v40  ;;  %v210_v33 = vadd.s32 %v209_v26, %v205_v15  ;;  %v442_v50 = vcvt.s32.f32 %v435_v29 }
  0xd4   :  { %463 = vst.msk [vmem:[%s849_s2 + $0x10] sm:$0xff] %vm254_vm11, %v359_v27  ;;  %vm138_vm7 = vweird.f32 %v566_v9  ;;  %vm362_vm8 = vcmp.lt.s32.totalorder %v572_v16, 0  ;;  %vm820_vm9 = vcmp.le.f32.partialorder %v360_v3, 0.7853982  ;;  %v446_v60 = vsub.s32 4, %v749_v32 }
  0xd5   :  { %v516_v28 = vpop.eup %515  ;;  %v440_v48 = vand.u32 2147483647, %v439_v31  ;;  %v211_v34 = vadd.s32 536870912, %v210_v33  ;;  %v206_v41 = vadd.s32 %v789_v11, %v787_v4  ;;  %vm452_vm15 = vweird.f32 %v572_v16 }
  0xd6   :  { %v518_v38 = vpop.eup %517  ;;  %v146_v44 = vxor.u32 2147483648, %v516_v28  ;;  %v447_v5 = vsel %vm362_vm8, %v446_v60, %v749_v32  ;;  %vm152_vm0 = vcmp.lt.s32.totalorder %v585_v37, 0  ;;  %vm151_vm1 = vcmp.le.f32.partialorder %v150_v14, 0.7853982 }
  0xd7   :  { %v143_v46 = vxor.u32 2147483648, %v518_v38  ;;  %v443_v36 = vmul.f32 %v442_v50, %v440_v48  ;;  %v212_v43 = vshrl.u32 %v211_v34, 30  ;;  %v449_v3 = vsel %vm820_vm9, 0, %v447_v5 }
  0xd8   :  { %v147_v51 = vsel %vm145_vm4, %v146_v44, %v518_v38  ;;  %v453_v22 = vand.u32 3, %v449_v3 }
  0xd9   :  { %v144_v52 = vsel %vm142_vm5, %v516_v28, %v143_v46  ;;  %v444_v47 = vxor.u32 2147483648, %v443_v36  ;;  %v213_v49 = vshll.u32 %v212_v43, 30  ;;  %v236_v18 = vsub.s32 4, %v212_v43 }
  0xda   :  { %v148_v53 = vsel %vm141_vm6, %v144_v52, %v147_v51  ;;  %vm458_vm12 = vcmp.eq.s32.totalorder %v453_v22, 2  ;;  %vm455_vm13 = vcmp.eq.s32.totalorder %v453_v22, 0  ;;  %vm454_vm14 = vcmp.lt.s32.totalorder %v453_v22, 2 }
  0xdb   :  { %v149_v45 = vsel %vm138_vm7, nan, %v148_v53  ;;  %v445_v54 = vsel %vm362_vm8, %v444_v47, %v443_v36  ;;  %v214_v55 = vsub.s32 %v210_v33, %v213_v49  ;;  %v237_v25 = vsel %vm152_vm0, %v236_v18, %v212_v43 }
  0xdc   :  { %255 = vst.msk [vmem:[%s849_s2] sm:$0xff] %vm254_vm11, %v149_v45  ;;  %v448_v9 = vsel %vm820_vm9, %v572_v16, %v445_v54  ;;  %v239_v27 = vsel %vm151_vm1, 0, %v237_v25  ;;  %vm242_vm5 = vweird.f32 %v585_v37 }
  0xdd   :  { %519 = vcosq.f32 %v448_v9  ;;  %v216_v59 = vsub.s32 0, %v214_v55  ;;  %v243_v30 = vadd.s32 3, %v239_v27 }
  0xde   :  { %521 = vsinq.f32 %v448_v9 }
  0xdf   :  { %v475_v63 = vmin.u32 %v216_v59, %v214_v55  ;;  %v244_v8 = vand.u32 3, %v243_v30 }
  0xe1   :  { %v218_v2 = vclz %v475_v63  ;;  %vm249_vm2 = vcmp.eq.s32.totalorder %v244_v8, 2  ;;  %vm246_vm3 = vcmp.eq.s32.totalorder %v244_v8, 0  ;;  %vm245_vm4 = vcmp.lt.s32.totalorder %v244_v8, 2 }
  0xe3   :  { %v476_v58 = vadd.s32 4294967294, %v218_v2 }
  0xe5   :  { %vm477_vm10 = vcmp.lt.s32.totalorder %v476_v58, 0 }
  0xe6   :  { %v221_v61 = vsel %vm477_vm10, 0, %v476_v58 }
  0xe7   :  { %v222_v62 = vsub.s32 32, %v221_v61  ;;  %v226_v39 = vsub.s32 4294967266, %v221_v61  ;;  %v223_v57 = vshll.u32 %v214_v55, %v221_v61 }
  0xe9   :  { %v224_v23 = vshrl.u32 %v206_v41, %v222_v62  ;;  %v227_v0 = vadd.s32 127, %v226_v39 }
  0xea   :  { %v520_v1 = vpop.eup %519 }
  0xeb   :  { %v522_v10 = vpop.eup %521  ;;  %v459_v6 = vxor.u32 2147483648, %v520_v1  ;;  %v225_v7 = vor.u32 %v224_v23, %v223_v57  ;;  %v228_v32 = vshll.u32 %v227_v0, 23 }
  0xec   :  { %v456_v13 = vxor.u32 2147483648, %v522_v10 }
  0xed   :  { %v460_v17 = vsel %vm458_vm12, %v459_v6, %v522_v10  ;;  %v229_v42 = vor.u32 4788187, %v228_v32  ;;  %v232_v19 = vcvt.s32.f32 %v225_v7 }
  0xee   :  { %v457_v35 = vsel %vm455_vm13, %v520_v1, %v456_v13 }
  0xef   :  { %v461_v4 = vsel %vm454_vm14, %v457_v35, %v460_v17  ;;  %v230_v11 = vand.u32 2147483647, %v229_v42 }
  0xf0   :  { %v462_v20 = vsel %vm452_vm15, nan, %v461_v4 }
  0xf1   :  { %464 = vst.msk [vmem:[%s849_s2 + $0x18] sm:$0xff] %vm254_vm11, %v462_v20  ;;  %v233_v21 = vmul.f32 %v232_v19, %v230_v11 }
  0xf3   :  { %v234_v24 = vxor.u32 2147483648, %v233_v21 }
  0xf5   :  { %v235_v12 = vsel %vm152_vm0, %v234_v24, %v233_v21 }
  0xf6   :  { %v238_v16 = vsel %vm151_vm1, %v585_v37, %v235_v12 }
  0xf7   :  { %523 = vcosq.f32 %v238_v16 }
  0xf8   :  { %525 = vsinq.f32 %v238_v16 }
 0x104   :  { %v524_v29 = vpop.eup %523 }
 0x105   :  { %v526_v40 = vpop.eup %525  ;;  %v250_v15 = vxor.u32 2147483648, %v524_v29 }
 0x106   :  { %v247_v26 = vxor.u32 2147483648, %v526_v40 }
 0x107   :  { %v251_v28 = vsel %vm249_vm2, %v250_v15, %v526_v40 }
 0x108   :  { %v248_v31 = vsel %vm246_vm3, %v524_v29, %v247_v26 }
 0x109   :  { %v252_v14 = vsel %vm245_vm4, %v248_v31, %v251_v28 }
 0x10a   :  { %v253_v33 = vsel %vm242_vm5, nan, %v252_v14 }
 0x10b   :  { %256 = vst.msk [vmem:[%s849_s2 + $0x8] sm:$0xff] %vm254_vm11, %v253_v33 }

</bundles_post_ra>
